<compile_context>
chip_gen: v7x
topology: tpu7x:2x2x1
jax: 0.10.0
libtpu: 0.0.40
codegen_flags: <defaults>
</compile_context>

<pallas_src>
import jax
import jax.numpy as jnp
from jax.experimental import pallas as pl
from jax.experimental.pallas import tpu as pltpu

# ---------------- synthetic small config (stands in for HuBERT/ESPnet sizes) --
AUDIO_LEN = 4096           # total samples
LIMIT = 2048               # stands in for self.limit = 160000 (chunk size)
WIN = 256                  # frontend "conv" window == hop -> framing is a reshape
FEAT_DIM = 128             # feature dim (stands in for HuBERT 1024)
NUM_EMOTIONS = 8
CLS_PAD = 128              # lane-dense padded classifier width
MAX_TILE_FRAMES = 256      # matmul M (frames) per grid step at real scale
NEG_INF = -1e30

EMOTION_LABELS = ["ang", "dis", "fea", "hap", "neu", "sad", "sur", "oth"]

assert LIMIT % WIN == 0    # chunk boundaries align with frames -> frame-tile
                           # gridding is exactly equivalent to the chunk loop.


def _round_up(x, m):
    return ((x + m - 1) // m) * m


# ----------------------------- fused kernel -----------------------------------
def _fused_kernel(nvalid_ref,    # SMEM scalar prefetch: (1,) int32 valid frames
                  frames_ref,    # [tile_frames, n_ch*WIN] bf16 framed audio
                  wf_ref,        # [n_ch*WIN, FEAT_DIM]    bf16 (channel-mean folded)
                  bf_ref,        # [1, FEAT_DIM]           f32
                  wc_ref,        # [FEAT_DIM, CLS_PAD]     f32
                  bc_ref,        # [1, CLS_PAD]            f32 (pad cols = -1e30)
                  probs_ref,     # out [1, CLS_PAD]        f32
                  logp_ref,      # out [1, CLS_PAD]        f32
                  sum_ref):      # scratch VMEM [1, FEAT_DIM] f32 (running sum)
    t = pl.program_id(0)
    nt = pl.num_programs(0)
    tile_frames = frames_ref.shape[0]

    @pl.when(t == 0)
    def _init():
        sum_ref[...] = jnp.zeros_like(sum_ref)

    # Frontend: stereo-mean + "feature_extractor" folded into one MXU matmul
    # (bf16 operands, f32 accumulation), then bias + ReLU on the VPU in f32.
    acc = jnp.dot(frames_ref[...], wf_ref[...],
                  preferred_element_type=jnp.float32)          # [tile, FEAT_DIM]
    feats = jnp.maximum(acc + bf_ref[...], 0.0)

    # Mask frames that are pure zero-padding (global frame id >= n_valid).
    n_valid = nvalid_ref[0]
    row = t * tile_frames + jax.lax.broadcasted_iota(jnp.int32, feats.shape, 0)
    feats = jnp.where(row < n_valid, feats, 0.0)

    # Running feature sum for the mean-pool (never materialize full feats).
    sum_ref[...] += jnp.sum(feats, axis=0, keepdims=True)

    # Epilogue on the last tile: mean-pool -> linear head -> softmax/log-softmax.
    @pl.when(t == nt - 1)
    def _finalize():
        pooled = sum_ref[...] / n_valid.astype(jnp.float32)    # [1, FEAT_DIM]
        logits = jnp.dot(pooled, wc_ref[...],
                         preferred_element_type=jnp.float32) + bc_ref[...]
        m = jnp.max(logits, axis=-1, keepdims=True)
        e = jnp.exp(logits - m)
        s = jnp.sum(e, axis=-1, keepdims=True)
        probs_ref[...] = e / s
        logp_ref[...] = (logits - m) - jnp.log(s)


def _build_fused_call(n_tiles, tile_frames, k_dim):
    grid_spec = pltpu.PrefetchScalarGridSpec(
        num_scalar_prefetch=1,
        grid=(n_tiles,),
        in_specs=[
            pl.BlockSpec((tile_frames, k_dim), lambda t, nv: (t, 0)),
            pl.BlockSpec((k_dim, FEAT_DIM),    lambda t, nv: (0, 0)),
            pl.BlockSpec((1, FEAT_DIM),        lambda t, nv: (0, 0)),
            pl.BlockSpec((FEAT_DIM, CLS_PAD),  lambda t, nv: (0, 0)),
            pl.BlockSpec((1, CLS_PAD),         lambda t, nv: (0, 0)),
        ],
        out_specs=(
            pl.BlockSpec((1, CLS_PAD), lambda t, nv: (0, 0)),
            pl.BlockSpec((1, CLS_PAD), lambda t, nv: (0, 0)),
        ),
        scratch_shapes=[pltpu.VMEM((1, FEAT_DIM), jnp.float32)],
    )
    return pl.pallas_call(
        _fused_kernel,
        out_shape=(jax.ShapeDtypeStruct((1, CLS_PAD), jnp.float32),
                   jax.ShapeDtypeStruct((1, CLS_PAD), jnp.float32)),
        grid_spec=grid_spec,
        compiler_params=pltpu.CompilerParams(
            # frame-tile axis carries the feature-sum accumulator
            dimension_semantics=("arbitrary",)),
    )


# ----------------------------- device-side forward (single jit) ----------------
def _forward_device(audio, w_feat, b_feat, w_cls, b_cls):
    # --- stereo handling: fold np.mean(audio, axis=1) into the matmul K dim ---
    if audio.ndim == 1:
        audio = audio[:, None]
    T, n_ch = audio.shape
    k_dim = n_ch * WIN

    # --- pad ragged tail to whole frame tiles; track valid-frame count ---
    n_valid_frames = -(-T // WIN)                              # ceil
    tile_frames = min(MAX_TILE_FRAMES, _round_up(max(n_valid_frames, 1), 16))
    n_tiles = max(1, -(-n_valid_frames // tile_frames))
    padded_frames = n_tiles * tile_frames
    padded_len = padded_frames * WIN

    audio_p = jnp.pad(audio.astype(jnp.float32),
                      ((0, padded_len - T), (0, 0)))
    # frames[f, s*n_ch + c] = audio_p[f*WIN + s, c]   (row-major reshape, no copy)
    frames = audio_p.reshape(padded_frames, k_dim).astype(jnp.bfloat16)

    # channel-mean folded into the weights: w_stack[s*n_ch + c, :] = w_feat[s]/n_ch
    w_stack = (jnp.repeat(w_feat, n_ch, axis=0) / n_ch).astype(jnp.bfloat16)

    # lane-dense classifier: pad to 128 columns, padded bias = -1e30 (softmax mask)
    wc_pad = jnp.pad(w_cls, ((0, 0), (0, CLS_PAD - NUM_EMOTIONS)))
    bc_pad = jnp.pad(b_cls, ((0, 0), (0, CLS_PAD - NUM_EMOTIONS)),
                     constant_values=NEG_INF)

    nvalid = jnp.array([n_valid_frames], jnp.int32)

    probs_p, logp_p = _build_fused_call(n_tiles, tile_frames, k_dim)(
        nvalid, frames, w_stack, b_feat, wc_pad, bc_pad)

    probs = probs_p[0, :NUM_EMOTIONS]                          # emo_out (continuous)
    logp = logp_p[0, :NUM_EMOTIONS]
    top = jnp.argmax(logp)                                     # on device
    return probs, top, logp[top]


_forward_jit = jax.jit(_forward_device)


# ----------------------------- forward (mirrors the torch module) --------------
def espnet_emotion_forward(audio, params):
    """audio: [T, 2] stereo (as sf.read returns) or [T] mono.
    Returns (discrete_emotion_label, its_log_score, continuous_emotion_probs)."""
    probs, top, score = _forward_jit(audio, params["w_feat"], params["b_feat"],
                                     params["w_cls"], params["b_cls"])
    top_i, score_f = jax.device_get((top, score))              # single host sync
    emotion_disc = EMOTION_LABELS[int(top_i)]                  # ''.join(text).replace(' ','')
    return emotion_disc, float(score_f), probs


# ----------------------------- main --------------------------------------------
if __name__ == "__main__":
    key = jax.random.PRNGKey(0)
    k_audio, k_wf, k_bf, k_wc, k_bc = jax.random.split(key, 5)

    audio = jax.random.normal(k_audio, (AUDIO_LEN, 2), dtype=jnp.float32)

    params = {
        "w_feat": 0.05 * jax.random.normal(k_wf, (WIN, FEAT_DIM), dtype=jnp.float32),
        "b_feat": 0.01 * jax.random.normal(k_bf, (1, FEAT_DIM), dtype=jnp.float32),
        "w_cls":  0.05 * jax.random.normal(k_wc, (FEAT_DIM, NUM_EMOTIONS), dtype=jnp.float32),
        "b_cls":  0.01 * jax.random.normal(k_bc, (1, NUM_EMOTIONS), dtype=jnp.float32),
    }

    emotion_disc, disc_prob, emotion_cts = espnet_emotion_forward(audio, params)
    emotion_cts = jax.block_until_ready(emotion_cts)

    assert emotion_cts.shape == (NUM_EMOTIONS,)
    assert isinstance(emotion_disc, str) and isinstance(disc_prob, float)
    assert abs(float(jnp.sum(emotion_cts)) - 1.0) < 1e-3        # softmax sanity
    print("KERNEL_OK")
</pallas_src>

<mosaic_0001>
module attributes {stable_mosaic.version = 11 : i64} {
  func.func @_fused_kernel(%arg0: i32, %arg1: memref<1xi32, #tpu.memory_space<smem>>, %arg2: memref<16x512xbf16, #tpu.memory_space<vmem>>, %arg3: memref<512x128xbf16, #tpu.memory_space<vmem>>, %arg4: memref<1x128xf32, #tpu.memory_space<vmem>>, %arg5: memref<128x128xf32, #tpu.memory_space<vmem>>, %arg6: memref<1x128xf32, #tpu.memory_space<vmem>>, %arg7: memref<1x128xf32, #tpu.memory_space<vmem>>, %arg8: memref<1x128xf32, #tpu.memory_space<vmem>>, %arg9: memref<1x128xf32, #tpu.memory_space<vmem>>) attributes {dimension_semantics = [#tpu.dimension_semantics<arbitrary>], iteration_bounds = array<i64: 1>, scalar_prefetch = 1 : i64, scratch_operands = 1 : i64, tpu.core_type = #tpu.core_type<tc>, window_params = [{transform_indices = @transform_0, window_bounds = array<i64: 16, 512>}, {pipeline_mode = #tpu.pipeline_mode<synchronous>, transform_indices = @transform_1, window_bounds = array<i64: 512, 128>}, {pipeline_mode = #tpu.pipeline_mode<synchronous>, transform_indices = @transform_2, window_bounds = array<i64: 1, 128>}, {pipeline_mode = #tpu.pipeline_mode<synchronous>, transform_indices = @transform_3, window_bounds = array<i64: 128, 128>}, {pipeline_mode = #tpu.pipeline_mode<synchronous>, transform_indices = @transform_4, window_bounds = array<i64: 1, 128>}, {pipeline_mode = #tpu.pipeline_mode<synchronous>, transform_indices = @transform_5, window_bounds = array<i64: 1, 128>}, {pipeline_mode = #tpu.pipeline_mode<synchronous>, transform_indices = @transform_6, window_bounds = array<i64: 1, 128>}]} {
    %c0_i32 = arith.constant 0 : i32
    %0 = arith.cmpi eq, %arg0, %c0_i32 : i32
    %1 = arith.extui %0 : i1 to i32
    %c0_i32_0 = arith.constant 0 : i32
    %2 = arith.cmpi ne, %1, %c0_i32_0 : i32
    scf.if %2 {
      %cst_16 = arith.constant 0.000000e+00 : f32
      %28 = vector.broadcast %cst_16 : f32 to vector<1x128xf32>
      %c0_17 = arith.constant 0 : index
      %c0_18 = arith.constant 0 : index
      %29 = vector.load %arg9[%c0_17, %c0_18] : memref<1x128xf32, #tpu.memory_space<vmem>>, vector<1x128xf32>
      tpu.vector_store %arg9[%c0_17, %c0_18], %28 {strides = array<i32>} : memref<1x128xf32, #tpu.memory_space<vmem>>, vector<1x128xf32>,
    } else {
    }
    %c0 = arith.constant 0 : index
    %c0_1 = arith.constant 0 : index
    %3 = vector.load %arg2[%c0, %c0_1] : memref<16x512xbf16, #tpu.memory_space<vmem>>, vector<16x512xbf16>
    %c0_2 = arith.constant 0 : index
    %c0_3 = arith.constant 0 : index
    %4 = vector.load %arg3[%c0_2, %c0_3] : memref<512x128xbf16, #tpu.memory_space<vmem>>, vector<512x128xbf16>
    %cst = arith.constant dense<0.000000e+00> : vector<16x128xf32>
    %5 = tpu.matmul %3, %4, %cst {dimension_numbers = #tpu.dot_dimension_numbers<[1], [0], [0], [1], [0, 0, 1, 1], [], []>} : vector<16x512xbf16>, vector<512x128xbf16>, vector<16x128xf32> -> vector<16x128xf32>
    %c0_4 = arith.constant 0 : index
    %c0_5 = arith.constant 0 : index
    %6 = vector.load %arg4[%c0_4, %c0_5] : memref<1x128xf32, #tpu.memory_space<vmem>>, vector<1x128xf32>
    %7 = vector.broadcast %6 : vector<1x128xf32> to vector<16x128xf32>
    %8 = arith.addf %5, %7 : vector<16x128xf32>
    %cst_6 = arith.constant 0.000000e+00 : f32
    %9 = vector.broadcast %cst_6 : f32 to vector<16x128xf32>
    %10 = arith.maximumf %8, %9 : vector<16x128xf32>
    %c0_7 = arith.constant 0 : index
    %11 = memref.load %arg1[%c0_7] : memref<1xi32, #tpu.memory_space<smem>>
    %c16_i32 = arith.constant 16 : i32
    %12 = arith.muli %arg0, %c16_i32 : i32
    %13 = tpu.iota {dimensions = array<i32: 0>} : vector<16x128xi32>
    %14 = vector.broadcast %12 : i32 to vector<16x128xi32>
    %15 = arith.addi %14, %13 : vector<16x128xi32>
    %16 = vector.broadcast %11 : i32 to vector<16x128xi32>
    %17 = arith.cmpi slt, %15, %16 : vector<16x128xi32>
    %cst_8 = arith.constant 0.000000e+00 : f32
    %18 = vector.broadcast %cst_8 : f32 to vector<16x128xf32>
    %19 = arith.select %17, %10, %18 : vector<16x128xi1>, vector<16x128xf32>
    %c0_9 = arith.constant 0 : index
    %c0_10 = arith.constant 0 : index
    %20 = vector.load %arg9[%c0_9, %c0_10] : memref<1x128xf32, #tpu.memory_space<vmem>>, vector<1x128xf32>
    %cst_11 = arith.constant dense<0.000000e+00> : vector<128xf32>
    %21 = vector.multi_reduction <add>, %19, %cst_11 [0] : vector<16x128xf32> to vector<128xf32>
    %22 = vector.shape_cast %21 : vector<128xf32> to vector<1x128xf32>
    %23 = arith.addf %20, %22 : vector<1x128xf32>
    %c0_12 = arith.constant 0 : index
    %c0_13 = arith.constant 0 : index
    %24 = vector.load %arg9[%c0_12, %c0_13] : memref<1x128xf32, #tpu.memory_space<vmem>>, vector<1x128xf32>
    tpu.vector_store %arg9[%c0_12, %c0_13], %23 {strides = array<i32>} : memref<1x128xf32, #tpu.memory_space<vmem>>, vector<1x128xf32>,
    %c0_i32_14 = arith.constant 0 : i32
    %25 = arith.cmpi eq, %arg0, %c0_i32_14 : i32
    %26 = arith.extui %25 : i1 to i32
    %c0_i32_15 = arith.constant 0 : i32
    %27 = arith.cmpi ne, %26, %c0_i32_15 : i32
    scf.if %27 {
      %c0_16 = arith.constant 0 : index
      %c0_17 = arith.constant 0 : index
      %28 = vector.load %arg9[%c0_16, %c0_17] : memref<1x128xf32, #tpu.memory_space<vmem>>, vector<1x128xf32>
      %29 = arith.sitofp %11 : i32 to f32
      %30 = vector.broadcast %29 : f32 to vector<1x128xf32>
      %31 = arith.divf %28, %30 : vector<1x128xf32>
      %c0_18 = arith.constant 0 : index
      %c0_19 = arith.constant 0 : index
      %32 = vector.load %arg5[%c0_18, %c0_19] : memref<128x128xf32, #tpu.memory_space<vmem>>, vector<128x128xf32>
      %cst_20 = arith.constant dense<0.000000e+00> : vector<1x128xf32>
      %33 = tpu.matmul %31, %32, %cst_20 {dimension_numbers = #tpu.dot_dimension_numbers<[1], [0], [0], [1], [0, 0, 1, 1], [], []>} : vector<1x128xf32>, vector<128x128xf32>, vector<1x128xf32> -> vector<1x128xf32>
      %c0_21 = arith.constant 0 : index
      %c0_22 = arith.constant 0 : index
      %34 = vector.load %arg6[%c0_21, %c0_22] : memref<1x128xf32, #tpu.memory_space<vmem>>, vector<1x128xf32>
      %35 = arith.addf %33, %34 : vector<1x128xf32>
      %cst_23 = arith.constant dense<0xFF800000> : vector<1xf32>
      %36 = vector.multi_reduction <maximumf>, %35, %cst_23 [1] : vector<1x128xf32> to vector<1xf32>
      %37 = vector.shape_cast %36 : vector<1xf32> to vector<1x1xf32>
      %38 = vector.broadcast %37 : vector<1x1xf32> to vector<1x128xf32>
      %39 = arith.subf %35, %38 : vector<1x128xf32>
      %40 = math.exp %39 : vector<1x128xf32>
      %cst_24 = arith.constant dense<0.000000e+00> : vector<1xf32>
      %41 = vector.multi_reduction <add>, %40, %cst_24 [1] : vector<1x128xf32> to vector<1xf32>
      %42 = vector.shape_cast %41 : vector<1xf32> to vector<1x1xf32>
      %43 = vector.broadcast %42 : vector<1x1xf32> to vector<1x128xf32>
      %44 = arith.divf %40, %43 : vector<1x128xf32>
      %c0_25 = arith.constant 0 : index
      %c0_26 = arith.constant 0 : index
      %45 = vector.load %arg7[%c0_25, %c0_26] : memref<1x128xf32, #tpu.memory_space<vmem>>, vector<1x128xf32>
      tpu.vector_store %arg7[%c0_25, %c0_26], %44 {strides = array<i32>} : memref<1x128xf32, #tpu.memory_space<vmem>>, vector<1x128xf32>,
      %46 = vector.broadcast %37 : vector<1x1xf32> to vector<1x128xf32>
      %47 = arith.subf %35, %46 : vector<1x128xf32>
      %48 = math.log %42 : vector<1x1xf32>
      %49 = vector.broadcast %48 : vector<1x1xf32> to vector<1x128xf32>
      %50 = arith.subf %47, %49 : vector<1x128xf32>
      %c0_27 = arith.constant 0 : index
      %c0_28 = arith.constant 0 : index
      %51 = vector.load %arg8[%c0_27, %c0_28] : memref<1x128xf32, #tpu.memory_space<vmem>>, vector<1x128xf32>
      tpu.vector_store %arg8[%c0_27, %c0_28], %50 {strides = array<i32>} : memref<1x128xf32, #tpu.memory_space<vmem>>, vector<1x128xf32>,
    } else {
    }
    return
  }
  func.func @transform_0(%arg0: i32, %arg1: memref<1xi32, #tpu.memory_space<smem>>) -> (i32, i32) {
    %c0_i32 = arith.constant 0 : i32
    %c0_i32_0 = arith.constant 0 : i32
    return %arg0, %c0_i32 : i32, i32
  }
  func.func @transform_1(%arg0: i32, %arg1: memref<1xi32, #tpu.memory_space<smem>>) -> (i32, i32) {
    %c0_i32 = arith.constant 0 : i32
    %c0_i32_0 = arith.constant 0 : i32
    %c0_i32_1 = arith.constant 0 : i32
    return %c0_i32, %c0_i32_0 : i32, i32
  }
  func.func @transform_2(%arg0: i32, %arg1: memref<1xi32, #tpu.memory_space<smem>>) -> (i32, i32) {
    %c0_i32 = arith.constant 0 : i32
    %c0_i32_0 = arith.constant 0 : i32
    %c0_i32_1 = arith.constant 0 : i32
    return %c0_i32, %c0_i32_0 : i32, i32
  }
  func.func @transform_3(%arg0: i32, %arg1: memref<1xi32, #tpu.memory_space<smem>>) -> (i32, i32) {
    %c0_i32 = arith.constant 0 : i32
    %c0_i32_0 = arith.constant 0 : i32
    %c0_i32_1 = arith.constant 0 : i32
    return %c0_i32, %c0_i32_0 : i32, i32
  }
  func.func @transform_4(%arg0: i32, %arg1: memref<1xi32, #tpu.memory_space<smem>>) -> (i32, i32) {
    %c0_i32 = arith.constant 0 : i32
    %c0_i32_0 = arith.constant 0 : i32
    %c0_i32_1 = arith.constant 0 : i32
    return %c0_i32, %c0_i32_0 : i32, i32
  }
  func.func @transform_5(%arg0: i32, %arg1: memref<1xi32, #tpu.memory_space<smem>>) -> (i32, i32) {
    %c0_i32 = arith.constant 0 : i32
    %c0_i32_0 = arith.constant 0 : i32
    %c0_i32_1 = arith.constant 0 : i32
    return %c0_i32, %c0_i32_0 : i32, i32
  }
  func.func @transform_6(%arg0: i32, %arg1: memref<1xi32, #tpu.memory_space<smem>>) -> (i32, i32) {
    %c0_i32 = arith.constant 0 : i32
    %c0_i32_0 = arith.constant 0 : i32
    %c0_i32_1 = arith.constant 0 : i32
    return %c0_i32, %c0_i32_0 : i32, i32
  }
}

</mosaic_0001>

<bundles_post_ra>
// kernel: _forward_device.1
= control target key start
LH: loop header
LB: loop body
LE: loop exit
PB: predicated region body
PF: predicated region fallthrough
CT: control target
= control target key end

     0   :  { %v750_v39 = vmov 0.0|0.0   ;;  %v751_v49 = vmov 0.0   ;;  %vm752_vm0 = vmmov 0   ;;  %v403_v62 = vlaneseq  ;;  %s967_s2 = inlined_call_operand.vmem [shape: bf16[512,128], index: 2, kind: input, shape index: {}]   ;;  %s968_s1 = inlined_call_operand.vmem [shape: bf16[16,512], index: 1, kind: input, shape index: {}]   ;;  %s969_s4 = inlined_call_operand.vmem [shape: f32[128,128], index: 4, kind: input, shape index: {}]   ;;  %s970_s3 = inlined_call_operand.vmem [shape: f32[1,128], index: 3, kind: input, shape index: {}]   ;;  %s971_s0 = inlined_call_operand.<no memory space> [shape: s32[1], index: 0, kind: input, shape index: {}]   ;;  %s972_s5 = inlined_call_operand.vmem [shape: f32[1,128], index: 5, kind: input, shape index: {}]   ;;  %s973_s6 = inlined_call_operand.vmem [shape: f32[1,128], index: 6, kind: output, shape index: {0}]   ;;  %s974_s7 = inlined_call_operand.vmem [shape: f32[1,128], index: 7, kind: output, shape index: {1}]  }
   0x1   :  { %v704_v0 = vld [vmem:[%s967_s2 + $0x40] sm:$0xff]   ;;  %v708_v4 = vld [vmem:[%s967_s2 + $0x48] sm:$0xff]   ;;  %v712_v8 = vld [vmem:[%s967_s2 + $0x50] sm:$0xff]   ;;  %29 = vst [vmem:[#allocation2] sm:$0x1] %v751_v49  ;;  %s428_s13 = scvt.s32.f32 %s971_s0  ;;  %vm519_vm3 = vcmask 1040384  }
   0x2   :  { %v705_v1 = vld [vmem:[%s967_s2 + $0xc0] sm:$0xff]   ;;  %581 = vmatprep.subr.bf16.mxu0 %v704_v0  ;;  %v709_v5 = vld [vmem:[%s967_s2 + $0xc8] sm:$0xff]   ;;  %v713_v9 = vld [vmem:[%s967_s2 + $0xd0] sm:$0xff]  }
   0x3   :  { %v706_v2 = vld [vmem:[%s967_s2] sm:$0xff]   ;;  %603 = vmatprep.subr.bf16.mxu1 %v705_v1  ;;  %v710_v6 = vld [vmem:[%s967_s2 + $0x8] sm:$0xff]   ;;  %v714_v10 = vld [vmem:[%s967_s2 + $0x10] sm:$0xff]  }
   0x4   :  { %v707_v3 = vld [vmem:[%s967_s2 + $0x80] sm:$0xff]   ;;  %582 = vmatpush3.bf16.msra.mxu0 %v706_v2  ;;  %v711_v7 = vld [vmem:[%s967_s2 + $0x88] sm:$0xff]   ;;  %v715_v11 = vld [vmem:[%s967_s2 + $0x90] sm:$0xff]  }
   0x5   :  { %604 = vmatpush3.bf16.msra.mxu1 %v707_v3  ;;  %583 = vmatprep.subr.bf16.mxu0 %v708_v4  ;;  %v716_v12 = vld [vmem:[%s967_s2 + $0x58] sm:$0xff]   ;;  %v720_v16 = vld [vmem:[%s967_s2 + $0x60] sm:$0xff]   ;;  %v724_v20 = vld [vmem:[%s967_s2 + $0x68] sm:$0xff]   ;;  %v404_v3 = vshrl.u32 %v403_v62, 7 }
   0x6   :  { %605 = vmatprep.subr.bf16.mxu1 %v709_v5  ;;  %v717_v13 = vld [vmem:[%s967_s2 + $0xd8] sm:$0xff]   ;;  %v721_v17 = vld [vmem:[%s967_s2 + $0xe0] sm:$0xff]   ;;  %v725_v21 = vld [vmem:[%s967_s2 + $0xe8] sm:$0xff]  }
   0x7   :  { %v718_v14 = vld [vmem:[%s967_s2 + $0x18] sm:$0xff]   ;;  %v722_v18 = vld [vmem:[%s967_s2 + $0x20] sm:$0xff]   ;;  %v726_v22 = vld [vmem:[%s967_s2 + $0x28] sm:$0xff]  }
   0x8   :  { %584 = vmatpush3.bf16.msra.mxu0 %v710_v6  ;;  %v719_v15 = vld [vmem:[%s967_s2 + $0x98] sm:$0xff]   ;;  %v723_v19 = vld [vmem:[%s967_s2 + $0xa0] sm:$0xff]   ;;  %v727_v23 = vld [vmem:[%s967_s2 + $0xa8] sm:$0xff]  }
   0x9   :  { %606 = vmatpush3.bf16.msra.mxu1 %v711_v7  ;;  %585 = vmatprep.subr.bf16.mxu0 %v712_v8  ;;  %v728_v24 = vld [vmem:[%s967_s2 + $0x70] sm:$0xff]   ;;  %v732_v28 = vld [vmem:[%s967_s2 + $0x78] sm:$0xff]   ;;  %v432_v36 = vld [vmem:[%s969_s4] sm:$0xff] }
   0xa   :  { %607 = vmatprep.subr.bf16.mxu1 %v713_v9  ;;  %v729_v25 = vld [vmem:[%s967_s2 + $0xf0] sm:$0xff]   ;;  %v733_v29 = vld [vmem:[%s967_s2 + $0xf8] sm:$0xff]   ;;  %v433_v37 = vld [vmem:[%s969_s4 + $0x8] sm:$0xff] }
   0xb   :  { %v730_v26 = vld [vmem:[%s967_s2 + $0x30] sm:$0xff]   ;;  %v734_v30 = vld [vmem:[%s967_s2 + $0x38] sm:$0xff]   ;;  %v678_v38 = vpack.c.bf16 %v433_v37, %v432_v36  ;;  %v436_v43 = vld [vmem:[%s969_s4 + $0x20] sm:$0xff] }
   0xc   :  { %586 = vmatpush3.bf16.msra.mxu0 %v714_v10  ;;  %v731_v27 = vld [vmem:[%s967_s2 + $0xb0] sm:$0xff]   ;;  %v735_v31 = vld [vmem:[%s967_s2 + $0xb8] sm:$0xff]   ;;  %v437_v44 = vld [vmem:[%s969_s4 + $0x28] sm:$0xff] }
   0xd   :  { %608 = vmatpush3.bf16.msra.mxu1 %v715_v11  ;;  %587 = vmatprep.subr.bf16.mxu0 %v716_v12  ;;  %v736_v32 = vld [vmem:[%s968_s1] ss:$16 sps:$4 sm:$0xff]   ;;  %v738_v33 = vld [vmem:[%s968_s1 + $0x4] ss:$16 sps:$4 sm:$0xff]   ;;  %v739_v34 = vld [vmem:[%s968_s1 + $0x8] ss:$16 sps:$4 sm:$0xff]   ;;  %v684_v45 = vpack.c.bf16 %v437_v44, %v436_v43 }
   0xe   :  { %609 = vmatprep.subr.bf16.mxu1 %v717_v13  ;;  %v741_v35 = vld [vmem:[%s968_s1 + $0xc] ss:$16 sps:$4 sm:$0xff]   ;;  %349 = vmatprep.mubr.bf16.mxu0 %v738_v33  ;;  %v434_v40 = vld [vmem:[%s969_s4 + $0x10] sm:$0xff]  ;;  %v440_v50 = vld [vmem:[%s969_s4 + $0x40] sm:$0xff] }
   0xf   :  { %390 = vmatprep.mubr.bf16.mxu1 %v741_v35  ;;  %v435_v41 = vld [vmem:[%s969_s4 + $0x18] sm:$0xff]  ;;  %v438_v46 = vld [vmem:[%s969_s4 + $0x30] sm:$0xff]  ;;  %v441_v51 = vld [vmem:[%s969_s4 + $0x48] sm:$0xff] }
  0x10   :  { %588 = vmatpush3.bf16.msra.mxu0 %v718_v14  ;;  %v681_v42 = vpack.c.bf16 %v435_v41, %v434_v40  ;;  %v439_v47 = vld [vmem:[%s969_s4 + $0x38] sm:$0xff]  ;;  %v690_v52 = vpack.c.bf16 %v441_v51, %v440_v50  ;;  %v442_v53 = vld [vmem:[%s969_s4 + $0x50] sm:$0xff]  ;;  %v444_v56 = vld [vmem:[%s969_s4 + $0x60] sm:$0xff]  ;;  %v405_v14 = vadd.s32 8, %v404_v3 }
  0x11   :  { %610 = vmatpush3.bf16.msra.mxu1 %v719_v15  ;;  %589 = vmatprep.subr.bf16.mxu0 %v720_v16  ;;  %v687_v48 = vpack.c.bf16 %v439_v47, %v438_v46  ;;  %v443_v54 = vld [vmem:[%s969_s4 + $0x58] sm:$0xff]  ;;  %v445_v57 = vld [vmem:[%s969_s4 + $0x68] sm:$0xff]  ;;  %v446_v59 = vld [vmem:[%s969_s4 + $0x70] sm:$0xff]  ;;  %v409_v16 = vstv %s971_s0 }
  0x12   :  { %611 = vmatprep.subr.bf16.mxu1 %v721_v17  ;;  %v693_v55 = vpack.c.bf16 %v443_v54, %v442_v53  ;;  %v696_v58 = vpack.c.bf16 %v445_v57, %v444_v56  ;;  %v447_v60 = vld [vmem:[%s969_s4 + $0x78] sm:$0xff]  ;;  %v544_v1 = vld [vmem:[%s970_s3] ss:$0 sm:$0xff]  ;;  %vm410_vm1 = vcmp.lt.s32.totalorder %v404_v3, %v409_v16  ;;  %vm411_vm2 = vcmp.lt.s32.totalorder %v405_v14, %v409_v16 }
  0x13   :  { %v699_v61 = vpack.c.bf16 %v447_v60, %v446_v59  ;;  %v448_v36 = vld [vmem:[%s972_s5] sm:$0x1] }
  0x14   :  { %590 = vmatpush3.bf16.msra.mxu0 %v722_v18 }
  0x15   :  { %612 = vmatpush3.bf16.msra.mxu1 %v723_v19  ;;  %591 = vmatprep.subr.bf16.mxu0 %v724_v20 }
  0x16   :  { %613 = vmatprep.subr.bf16.mxu1 %v725_v21 }
  0x18   :  { %592 = vmatpush3.bf16.msra.mxu0 %v726_v22 }
  0x19   :  { %614 = vmatpush3.bf16.msra.mxu1 %v727_v23  ;;  %593 = vmatprep.subr.bf16.mxu0 %v728_v24 }
  0x1a   :  { %615 = vmatprep.subr.bf16.mxu1 %v729_v25 }
  0x1c   :  { %594 = vmatpush3.bf16.msra.mxu0 %v730_v26 }
  0x1d   :  { %616 = vmatpush3.bf16.msra.mxu1 %v731_v27  ;;  %595 = vmatprep.subr.bf16.mxu0 %v732_v28  ;;  %v429_v27 = vstv %s428_s13 }
  0x1e   :  { %617 = vmatprep.subr.bf16.mxu1 %v733_v29  ;;  %742 = vrcp.f32 %v429_v27 }
  0x20   :  { %596 = vmatpush3.bf16.msra.mxu0 %v734_v30  ;;  %v414_v30 = vld [vmem:[#allocation2] sm:$0x1] }
  0x21   :  { %618 = vmatpush3.bf16.msra.mxu1 %v735_v31  ;;  %677 = vmatprep.subr.bf16.mxu0 %v750_v39 }
  0x23   :  { %350 = vmatmul.mubr.bf16.vlgmr.msra.gmra.mrb[0].mxu0 %v736_v32 }
  0x24   :  { %391 = vmatmul.mubr.bf16.vlgmr.msra.gmra.mrb[0].mxu1 %v739_v34  ;;  %679 = vmatpush3.bf16.msra.mxu0 %v678_v38 }
  0x25   :  { %680 = vmatprep.subr.bf16.mxu0 %v750_v39  ;;  %674 = vmatprep.mubr.msk.f32.mxu0 %vm752_vm0, %v751_v49 }
  0x28   :  { %682 = vmatpush3.bf16.msra.mxu0 %v681_v42  ;;  %v743_v33 = vpop.eup %742 }
  0x29   :  { %683 = vmatprep.subr.bf16.mxu0 %v750_v39 }
  0x2c   :  { %685 = vmatpush3.bf16.msra.mxu0 %v684_v45 }
  0x2d   :  { %686 = vmatprep.subr.bf16.mxu0 %v750_v39 }
  0x30   :  { %688 = vmatpush3.bf16.msra.mxu0 %v687_v48 }
  0x31   :  { %689 = vmatprep.subr.bf16.mxu0 %v750_v39 }
  0x34   :  { %691 = vmatpush3.bf16.msra.mxu0 %v690_v52 }
  0x35   :  { %692 = vmatprep.subr.bf16.mxu0 %v750_v39 }
  0x38   :  { %694 = vmatpush3.bf16.msra.mxu0 %v693_v55 }
  0x39   :  { %695 = vmatprep.subr.bf16.mxu0 %v750_v39 }
  0x3c   :  { %697 = vmatpush3.bf16.msra.mxu0 %v696_v58 }
  0x3d   :  { %698 = vmatprep.subr.bf16.mxu0 %v750_v39 }
  0x40   :  { %700 = vmatpush3.bf16.msra.mxu0 %v699_v61 }
  0xf6   :  { %v597_v63 = vpop.f32.mrb[0].mxu0 }
  0xf7   :  { %v619_v0 = vpop.f32.mrb[0].mxu1  ;;  %v598_v2 = vpop.f32.mrb[1].mxu0 }
  0xf8   :  { %v599_v4 = vadd.f32 %v598_v2, %v597_v63  ;;  %v620_v5 = vpop.f32.mrb[1].mxu1  ;;  %v600_v6 = vpop.f32.mrb[2].mxu0 }
  0xf9   :  { %v621_v7 = vadd.f32 %v620_v5, %v619_v0  ;;  %v622_v8 = vpop.f32.mrb[2].mxu1  ;;  %v601_v9 = vpop.f32.mrb[3].mxu0 }
  0xfa   :  { %v352_v10 = vadd.f32 %v599_v4, %v544_v1  ;;  %v602_v11 = vadd.f32 %v601_v9, %v600_v6  ;;  %v623_v12 = vpop.f32.mrb[3].mxu1 }
  0xfb   :  { %v624_v13 = vadd.f32 %v623_v12, %v622_v8 }
  0xfc   :  { %v393_v15 = vadd.f32 %v621_v7, %v352_v10  ;;  %v355_v17 = vadd.f32 %v602_v11, %v544_v1 }
  0xfe   :  { %v399_v18 = vmax.f32 %v393_v15, 0.0  ;;  %v396_v19 = vadd.f32 %v624_v13, %v355_v17 }
 0x100   :  { %v400_v20 = vmax.f32 %v396_v19, 0.0  ;;  %v412_v21 = vsel %vm410_vm1, %v399_v18, 0.0 }
 0x102   :  { %v413_v22 = vsel %vm411_vm2, %v400_v20, 0.0 }
 0x103   :  { %v415_v23 = vadd.f32 %v413_v22, %v412_v21 }
 0x105   :  { %v416_v24 = vrot.slane %v415_v23, 4 }
 0x107   :  { %v417_v25 = vadd.f32 %v416_v24, %v415_v23 }
 0x109   :  { %v418_v26 = vrot.slane %v417_v25, 2 }
 0x10b   :  { %v419_v28 = vadd.f32 %v418_v26, %v417_v25 }
 0x10d   :  { %v420_v29 = vrot.slane %v419_v28, 1 }
 0x10f   :  { %v421_v31 = vadd.f32 %v420_v29, %v419_v28 }
 0x111   :  { %v422_v32 = vadd.f32 %v421_v31, %v414_v30 }
 0x113   :  { %423 = vst [vmem:[#allocation2] sm:$0x1] %v422_v32 }
 0x11a   :  { %v427_v34 = vld [vmem:[#allocation2] sm:$0x1] }
 0x11b   :  { %v431_v35 = vmul.f32 %v743_v33, %v427_v34 }
 0x11d   :  { %675 = vmatmul.mubr.f32.vlgmr.msra.gmra.mrb[4].mxu0 %v431_v35 }
 0x1f0   :  { %v515_v37 = vpop.f32.mrb[4].mxu0 }
 0x1f1   :  { %v516_v38 = vadd.f32 %v515_v37, %v448_v36  ;;  %v676_v39 = vpop.f32.mrb[5].mxu0 }
 0x1f3   :  { %v520_v40 = vsel %vm519_vm3, %v516_v38, -inf }
 0x1f4   :  { %521 = vmax.xlane.f32.xlu0 %v520_v40 }
 0x281   :  { %v522_v41 = vpop.xlane.xlu0 %521 }
 0x282   :  { %v523_v42 = vsub.f32 %v516_v38, %v522_v41 }
 0x284   :  { %v524_v43 = vmul.f32 1.442695, %v523_v42 }
 0x286   :  { %744 = vpow2.f32 %v524_v43 }
 0x290   :  { %v745_v44 = vpop.eup %744 }
 0x291   :  { %v526_v45 = vsel %vm519_vm3, %v745_v44, 0.0 }
 0x292   :  { %527 = vadd.xlane.f32.xlu0 %v526_v45 }
 0x31f   :  { %v528_v46 = vpop.xlane.xlu0 %527 }
 0x320   :  { %746 = vrcp.f32 %v528_v46 }
 0x321   :  { %748 = vlog2.f32 %v528_v46 }
 0x32a   :  { %v747_v47 = vpop.eup %746 }
 0x32b   :  { %v749_v48 = vpop.eup %748  ;;  %v530_v49 = vmul.f32 %v747_v47, %v745_v44 }
 0x32c   :  { %v533_v50 = vmul.f32 0.6931472, %v749_v48 }
 0x32d   :  { %531 = vst [vmem:[%s973_s6] sm:$0x1] %v530_v49 }
 0x32e   :  { %v534_v51 = vsub.f32 %v523_v42, %v533_v50 }
 0x330   :  { %535 = vst [vmem:[%s974_s7] sm:$0x1] %v534_v51 }

</bundles_post_ra>
